<compile_context>
chip_gen: v7x
topology: tpu7x:2x2x1
jax: 0.10.0
libtpu: 0.0.40
codegen_flags: <defaults>
</compile_context>

<pallas_src>
import functools
import math

import jax
import jax.numpy as jnp
import numpy as np
from jax.experimental import pallas as pl
from jax.experimental.pallas import tpu as pltpu


def _round_up(x, m):
    return ((x + m - 1) // m) * m


def _sinusoidal_emb_kernel(time_ref, freqs_ref, phase_ref, o_ref, *, bt):
    """One output row tile: o[i*bt:(i+1)*bt, :] = sin(t * freqs + phase)."""
    row0 = pl.multiple_of(pl.program_id(0) * bt, bt)
    t = time_ref[pl.ds(row0, bt), :]          # [bt, 1]  f32 (resident column)
    freqs = freqs_ref[...]                    # [1, dim] resident constant
    phase = phase_ref[...]                    # [1, dim] resident constant
    # cos(x) == sin(x + pi/2): one transcendental per element, no select/mask.
    o_ref[...] = jnp.sin(t * freqs + phase).astype(o_ref.dtype)


def sinusoidal_position_embeddings(time, dim, *, block_rows=4096,
                                   out_dtype=jnp.float32):
    """time: [B] (int or float). Returns [B, dim] sinusoidal embeddings.

    Matches torch.cat((sin(t*f), cos(t*f)), -1) with f = exp(arange(dim//2) *
    -log(10000)/(dim//2 - 1)).
    """
    if dim % 2 != 0 or dim < 4:
        # half_dim - 1 == 0 would divide by zero (same failure as the PyTorch
        # module); odd dim would not match the reference concatenation width.
        raise ValueError("dim must be even and >= 4")
    B = time.shape[0]
    half_dim = dim // 2

    # Host-side baked constants: frequencies duplicated for the sin/cos halves,
    # and an additive phase (0 for the sin half, pi/2 for the cos half).
    scale = math.log(10000.0) / (half_dim - 1)
    freqs_half = np.exp(np.arange(half_dim, dtype=np.float32) * np.float32(-scale))
    freqs = np.concatenate([freqs_half, freqs_half]).reshape(1, dim).astype(np.float32)
    phase = np.concatenate(
        [np.zeros(half_dim, np.float32),
         np.full(half_dim, math.pi / 2.0, np.float32)]).reshape(1, dim)

    # Row tiling: 1 tile for small B (dispatch-bound); >= 2 tiles for larger B
    # so the "parallel" batch axis can use both v7x TensorCores; cap at
    # block_rows. All tile sizes are multiples of 8 (sublane alignment).
    block_rows = max(8, _round_up(block_rows, 8))
    b8 = _round_up(max(B, 1), 8)
    if b8 > block_rows:
        bt = block_rows
    elif b8 >= 256:
        bt = _round_up(pl.cdiv(b8, 2), 8)
    else:
        bt = b8
    grid_n = pl.cdiv(b8, bt)
    b_pad = grid_n * bt

    t2 = time.astype(jnp.float32).reshape(B, 1)
    if b_pad != B:
        t2 = jnp.pad(t2, ((0, b_pad - B), (0, 0)))

    out_bytes = np.dtype(out_dtype).itemsize
    cost = pl.CostEstimate(
        flops=2 * b_pad * dim,              # mul + add per element
        transcendentals=b_pad * dim,        # one sin per element
        bytes_accessed=b_pad * 4 + 2 * dim * 4 + b_pad * dim * out_bytes,
    )

    kernel = functools.partial(_sinusoidal_emb_kernel, bt=bt)
    out = pl.pallas_call(
        kernel,
        out_shape=jax.ShapeDtypeStruct((b_pad, dim), out_dtype),
        grid_spec=pltpu.PrefetchScalarGridSpec(
            num_scalar_prefetch=0,
            grid=(grid_n,),
            in_specs=[
                # Whole time column, loaded once and kept resident (constant
                # index_map). NOTE: a (N,1) column pads to N*512 B in VMEM, fine
                # for any realistic diffusion batch size.
                pl.BlockSpec((b_pad, 1), lambda i: (0, 0)),
                pl.BlockSpec((1, dim), lambda i: (0, 0)),     # freqs row (resident)
                pl.BlockSpec((1, dim), lambda i: (0, 0)),     # phase row (resident)
            ],
            out_specs=pl.BlockSpec((bt, dim), lambda i: (i, 0)),  # lane-dense tile
        ),
        compiler_params=pltpu.CompilerParams(
            dimension_semantics=("parallel",)),   # row tiles independent
        cost_estimate=cost,
    )(t2, jnp.asarray(freqs), jnp.asarray(phase))

    return out[:B] if b_pad != B else out


def reference(time, dim):
    """Pure-JAX mirror of the PyTorch forward."""
    half_dim = dim // 2
    scale = math.log(10000.0) / (half_dim - 1)
    freqs = jnp.exp(jnp.arange(half_dim, dtype=jnp.float32) * -scale)
    emb = time.astype(jnp.float32)[:, None] * freqs[None, :]
    return jnp.concatenate([jnp.sin(emb), jnp.cos(emb)], axis=-1)


if __name__ == "__main__":
    # Typical diffusion shapes: a small batch of integer timesteps, dim=128.
    B, dim = 8, 128
    time = jax.random.randint(jax.random.PRNGKey(0), (B,), 0, 1000).astype(jnp.float32)

    y = jax.block_until_ready(sinusoidal_position_embeddings(time, dim))
    y_ref = reference(time, dim)
    err = float(jnp.max(jnp.abs(y - y_ref)))
    if not (y.shape == (B, dim) and math.isfinite(err) and err < 1e-2):
        raise RuntimeError(f"mismatch vs reference (B={B}): max_err={err}")

    # Also exercise the multi-tile + padded-batch path (2 row tiles, B % 8 != 0).
    B2 = 300
    time2 = jax.random.randint(jax.random.PRNGKey(1), (B2,), 0, 1000).astype(jnp.float32)
    y2 = jax.block_until_ready(sinusoidal_position_embeddings(time2, dim))
    err2 = float(jnp.max(jnp.abs(y2 - reference(time2, dim))))
    if not (y2.shape == (B2, dim) and math.isfinite(err2) and err2 < 1e-2):
        raise RuntimeError(f"mismatch vs reference (B={B2}): max_err={err2}")

    print("KERNEL_OK")
</pallas_src>

<mosaic_0001>
module attributes {stable_mosaic.version = 11 : i64} {
  func.func @_sinusoidal_emb_kernel(%arg0: i32, %arg1: memref<8x1xf32, #tpu.memory_space<vmem>>, %arg2: memref<1x128xf32, #tpu.memory_space<vmem>>, %arg3: memref<1x128xf32, #tpu.memory_space<vmem>>, %arg4: memref<8x128xf32, #tpu.memory_space<vmem>>) attributes {dimension_semantics = [#tpu.dimension_semantics<parallel>], iteration_bounds = array<i64: 1>, scalar_prefetch = 0 : i64, scratch_operands = 0 : i64, tpu.core_type = #tpu.core_type<tc>, window_params = [{pipeline_mode = #tpu.pipeline_mode<synchronous>, transform_indices = @transform_0, window_bounds = array<i64: 8, 1>}, {pipeline_mode = #tpu.pipeline_mode<synchronous>, transform_indices = @transform_1, window_bounds = array<i64: 1, 128>}, {pipeline_mode = #tpu.pipeline_mode<synchronous>, transform_indices = @transform_2, window_bounds = array<i64: 1, 128>}, {transform_indices = @transform_3, window_bounds = array<i64: 8, 128>}]} {
    %c8_i32 = arith.constant 8 : i32
    %0 = arith.muli %arg0, %c8_i32 : i32
    %1 = tpu.assume_multiple %0, 8 : i32
    %2 = arith.index_cast %1 : i32 to index
    %c0 = arith.constant 0 : index
    %3 = vector.load %arg1[%2, %c0] : memref<8x1xf32, #tpu.memory_space<vmem>>, vector<8x1xf32>
    %c0_0 = arith.constant 0 : index
    %c0_1 = arith.constant 0 : index
    %4 = vector.load %arg2[%c0_0, %c0_1] : memref<1x128xf32, #tpu.memory_space<vmem>>, vector<1x128xf32>
    %c0_2 = arith.constant 0 : index
    %c0_3 = arith.constant 0 : index
    %5 = vector.load %arg3[%c0_2, %c0_3] : memref<1x128xf32, #tpu.memory_space<vmem>>, vector<1x128xf32>
    %6 = vector.broadcast %3 : vector<8x1xf32> to vector<8x128xf32>
    %7 = vector.broadcast %4 : vector<1x128xf32> to vector<8x128xf32>
    %8 = arith.mulf %6, %7 : vector<8x128xf32>
    %9 = vector.broadcast %5 : vector<1x128xf32> to vector<8x128xf32>
    %10 = arith.addf %8, %9 : vector<8x128xf32>
    %11 = math.sin %10 : vector<8x128xf32>
    %c0_4 = arith.constant 0 : index
    %c0_5 = arith.constant 0 : index
    %12 = vector.load %arg4[%c0_4, %c0_5] : memref<8x128xf32, #tpu.memory_space<vmem>>, vector<8x128xf32>
    tpu.vector_store %arg4[%c0_4, %c0_5], %11 {strides = array<i32>} : memref<8x128xf32, #tpu.memory_space<vmem>>, vector<8x128xf32>,
    return
  }
  func.func @transform_0(%arg0: i32) -> (i32, i32) {
    %c0_i32 = arith.constant 0 : i32
    %c0_i32_0 = arith.constant 0 : i32
    %c0_i32_1 = arith.constant 0 : i32
    return %c0_i32, %c0_i32_0 : i32, i32
  }
  func.func @transform_1(%arg0: i32) -> (i32, i32) {
    %c0_i32 = arith.constant 0 : i32
    %c0_i32_0 = arith.constant 0 : i32
    %c0_i32_1 = arith.constant 0 : i32
    return %c0_i32, %c0_i32_0 : i32, i32
  }
  func.func @transform_2(%arg0: i32) -> (i32, i32) {
    %c0_i32 = arith.constant 0 : i32
    %c0_i32_0 = arith.constant 0 : i32
    %c0_i32_1 = arith.constant 0 : i32
    return %c0_i32, %c0_i32_0 : i32, i32
  }
  func.func @transform_3(%arg0: i32) -> (i32, i32) {
    %c0_i32 = arith.constant 0 : i32
    %c0_i32_0 = arith.constant 0 : i32
    return %arg0, %c0_i32 : i32, i32
  }
}

</mosaic_0001>

<bundles_post_ra>
// kernel: tpu_custom_call.1
= control target key start
LH: loop header
LB: loop body
LE: loop exit
PB: predicated region body
PF: predicated region fallthrough
CT: control target
= control target key end

     0   :  { %v205_v1 = vmov 0   ;;  %s275_s0 = inlined_call_operand.vmem [shape: f32[8,1], index: 0, kind: input, shape index: {}]   ;;  %s276_s1 = inlined_call_operand.vmem [shape: f32[1,128], index: 1, kind: input, shape index: {}]   ;;  %s277_s2 = inlined_call_operand.vmem [shape: f32[1,128], index: 2, kind: input, shape index: {}]   ;;  %s278_s3 = inlined_call_operand.hbm [shape: f32[8,128], index: 3, kind: output, shape index: {}]  }
   0x1   :  { %v17_v0 = vld [vmem:[%s275_s0] sm:$0xff]  ;;  %176 = vset.pattern.permute.xlu0 %v205_v1 }
   0x2   :  { %22 = vperm.xlu0 %176, %v17_v0  }
   0x3   :  { %8 = vsyncpa [#allocation3], 0  ;;  %v158_v2 = vld [vmem:[%s276_s1] ss:$0 sm:$0xff]  ;;  %v206_v18 = vmov 2102212464  }
   0x4   :  { %v159_v3 = vld [vmem:[%s277_s2] ss:$0 sm:$0xff]  ;;  %v207_v20 = vmov 920167782   ;;  %v208_v24 = vmov 1326507024  }
   0x5   :  { %v209_v26 = vmov 683565275   ;;  %v210_v28 = vmov 2475754826   ;;  %v211_v31 = vmov 2131351028  }
   0x6   :  { %s212_s0 = smov [#allocation2]  }
   0x7   :  { %s150_s1 = sshll.u32 %s212_s0, 4  ;;  %s151_s1 = int_to_ptr.vmem [resolvable:$true] %s150_s1 }
   0x8   :  { %s181_s2 = scalar_lea.vmem %s151_s1, 128  ;;  %p186_p1 = scmp.lt.s32.totalorder %s151_s1, %s151_s1 }
   0x9   :  { %p182_p0 = scmp.ne.s32.totalorder %s151_s1, %s181_s2  ;;  %p187_p2 = scmp.lt.s32.totalorder %s181_s2, %s181_s2 }
   0xb   :  { %p188_p3 = por %p187_p2, %p186_p1 }
   0xd   :  { %p189_p4 = pnand %p188_p3, %p182_p0 }
  0x81   :  { %v23_v4 = vpop.permute.xlu0 %22 }
  0x82   :  { %v31_v5 = vmul.f32 %v158_v2, %v23_v4 }
  0x84   :  { %v242_v6 = vadd.f32 %v159_v3, %v31_v5 }
  0x86   :  { %v42_v7 = vand.u32 2139095040, %v242_v6  ;;  %v39_v8 = vand.u32 2147483647, %v242_v6  ;;  %vm41_vm7 = vcmp.lt.s32.totalorder %v242_v6, 0  ;;  %vm131_vm12 = vweird.f32 %v242_v6 }
  0x88   :  { %v43_v9 = vshrl.u32 %v42_v7, 23  ;;  %v46_v11 = vand.u32 8388607, %v39_v8  ;;  %vm40_vm8 = vcmp.le.f32.partialorder %v39_v8, 0.7853982 }
  0x8a   :  { %v160_v10 = vadd.s32 4294967169, %v43_v9  ;;  %v47_v14 = vor.u32 8388608, %v46_v11 }
  0x8c   :  { %v49_v12 = vadd.s32 1, %v160_v10  ;;  %v87_v22 = vshll.u32 %v47_v14, 8 }
  0x8e   :  { %vm50_vm0 = vcmp.gt.s32.totalorder %v49_v12, 0 }
  0x8f   :  { %v51_v13 = vsel %vm50_vm0, %v49_v12, 0 }
  0x90   :  { %v53_v15 = vand.u32 31, %v51_v13  ;;  %v52_v16 = vshrl.u32 %v51_v13, 5 }
  0x92   :  { %v54_v17 = vsub.s32 32, %v53_v15  ;;  %v65_v19 = vshll.u32 %v206_v18, %v53_v15  ;;  %v68_v21 = vshll.u32 %v207_v20, %v53_v15  ;;  %v56_v27 = vshll.u32 %v209_v26, %v53_v15 }
  0x93   :  { %v59_v30 = vshll.u32 %v210_v28, %v53_v15  ;;  %v62_v33 = vshll.u32 %v211_v31, %v53_v15  ;;  %vm74_vm1 = vcmp.lt.s32.totalorder %v52_v16, 4  ;;  %vm71_vm2 = vcmp.lt.s32.totalorder %v52_v16, 1 }
  0x94   :  { %v66_v23 = vshrl.u32 %v207_v20, %v54_v17  ;;  %v69_v25 = vshrl.u32 %v208_v24, %v54_v17  ;;  %v57_v29 = vshrl.u32 %v210_v28, %v54_v17  ;;  %v60_v32 = vshrl.u32 %v211_v31, %v54_v17 }
  0x95   :  { %v63_v34 = vshrl.u32 %v206_v18, %v54_v17  ;;  %v55_v38 = vshrl.u32 %v209_v26, %v54_v17  ;;  %vm72_vm3 = vcmp.lt.s32.totalorder %v52_v16, 2  ;;  %vm73_vm4 = vcmp.lt.s32.totalorder %v52_v16, 3 }
  0x96   :  { %v67_v35 = vor.u32 %v66_v23, %v65_v19  ;;  %v70_v36 = vor.u32 %v69_v25, %v68_v21  ;;  %v58_v37 = vor.u32 %v57_v29, %v56_v27  ;;  %v61_v39 = vor.u32 %v60_v32, %v59_v30 }
  0x97   :  { %v64_v40 = vor.u32 %v63_v34, %v62_v33 }
  0x98   :  { %v80_v41 = vsel %vm74_vm1, %v67_v35, 920167782  ;;  %v84_v42 = vsel %vm74_vm1, %v70_v36, 1326507024  ;;  %v79_v44 = vsel %vm71_vm2, %v58_v37, %v61_v39  ;;  %v75_v47 = vsel %vm71_vm2, %v55_v38, %v58_v37 }
  0x99   :  { %v76_v43 = vsel %vm74_vm1, %v64_v40, 2102212464  ;;  %v81_v45 = vsel %vm73_vm4, %v64_v40, %v80_v41  ;;  %v83_v46 = vsel %vm71_vm2, %v61_v39, %v64_v40  ;;  %v85_v50 = vsel %vm73_vm4, %v67_v35, %v84_v42 }
  0x9a   :  { %v77_v48 = vsel %vm73_vm4, %v61_v39, %v76_v43  ;;  %v82_v49 = vsel %vm72_vm3, %v79_v44, %v81_v45  ;;  %v86_v51 = vsel %vm72_vm3, %v83_v46, %v85_v50 }
  0x9b   :  { %v248_v52 = vmul.u32.u64.low %v87_v22, %v82_v49  ;;  %v249_v53 = vmul.u32.u64.high %v87_v22, %v82_v49, %v248_v52  ;;  %v251_v54 = vmul.u32.u64.low %v87_v22, %v86_v51  ;;  %v252_v55 = vmul.u32.u64.high %v87_v22, %v86_v51, %v251_v54 }
  0x9c   :  { %v78_v56 = vsel %vm72_vm3, %v75_v47, %v77_v48 }
  0x9d   :  { %v97_v57 = vadd.s32 1, %v249_v53  ;;  %v94_v58 = vmul.u32 %v87_v22, %v78_v56  ;;  %vm96_vm5 = vc.u32 %v252_v55, %v248_v52  ;;  %v95_v7 = vadd.s32 %v248_v52, %v252_v55 }
  0x9f   :  { %v98_v59 = vsel %vm96_vm5, %v97_v57, %v249_v53 }
  0xa0   :  { %v99_v60 = vadd.s32 %v98_v59, %v94_v58 }
  0xa2   :  { %v100_v61 = vadd.s32 536870912, %v99_v60 }
  0xa4   :  { %v101_v62 = vshrl.u32 %v100_v61, 30 }
  0xa6   :  { %v102_v63 = vshll.u32 %v101_v62, 30  ;;  %v125_v20 = vsub.s32 4, %v101_v62 }
  0xa8   :  { %v103_v0 = vsub.s32 %v99_v60, %v102_v63  ;;  %v126_v23 = vsel %vm41_vm7, %v125_v20, %v101_v62 }
  0xa9   :  { %v128_v25 = vsel %vm40_vm8, 0, %v126_v23 }
  0xaa   :  { %v105_v1 = vsub.s32 0, %v103_v0  ;;  %v132_v26 = vadd.s32 3, %v128_v25 }
  0xac   :  { %v161_v2 = vmin.u32 %v105_v1, %v103_v0  ;;  %v133_v27 = vand.u32 3, %v132_v26 }
  0xae   :  { %v107_v3 = vclz %v161_v2  ;;  %vm138_vm9 = vcmp.eq.s32.totalorder %v133_v27, 2  ;;  %vm135_vm10 = vcmp.eq.s32.totalorder %v133_v27, 0  ;;  %vm134_vm11 = vcmp.lt.s32.totalorder %v133_v27, 2 }
  0xb0   :  { %v162_v4 = vadd.s32 4294967294, %v107_v3 }
  0xb2   :  { %vm163_vm6 = vcmp.lt.s32.totalorder %v162_v4, 0 }
  0xb3   :  { %v110_v5 = vsel %vm163_vm6, 0, %v162_v4 }
  0xb4   :  { %v111_v9 = vsub.s32 32, %v110_v5  ;;  %v115_v10 = vsub.s32 4294967266, %v110_v5  ;;  %v112_v11 = vshll.u32 %v103_v0, %v110_v5 }
  0xb6   :  { %v113_v12 = vshrl.u32 %v95_v7, %v111_v9  ;;  %v116_v13 = vadd.s32 127, %v115_v10 }
  0xb8   :  { %v114_v14 = vor.u32 %v113_v12, %v112_v11  ;;  %v117_v15 = vshll.u32 %v116_v13, 23 }
  0xba   :  { %v118_v16 = vor.u32 4788187, %v117_v15  ;;  %v121_v18 = vcvt.s32.f32 %v114_v14 }
  0xbc   :  { %v119_v17 = vand.u32 2147483647, %v118_v16 }
  0xbe   :  { %v122_v19 = vmul.f32 %v121_v18, %v119_v17 }
  0xc0   :  { %v123_v21 = vxor.u32 2147483648, %v122_v19 }
  0xc2   :  { %v124_v22 = vsel %vm41_vm7, %v123_v21, %v122_v19 }
  0xc3   :  { %v127_v24 = vsel %vm40_vm8, %v242_v6, %v124_v22 }
  0xc4   :  { %177 = vcosq.f32 %v127_v24 }
  0xc5   :  { %179 = vsinq.f32 %v127_v24 }
  0xce   :  { %v178_v28 = vpop.eup %177 }
  0xcf   :  { %v180_v29 = vpop.eup %179  ;;  %v139_v30 = vxor.u32 2147483648, %v178_v28 }
  0xd0   :  { %v136_v31 = vxor.u32 2147483648, %v180_v29 }
  0xd1   :  { %v140_v32 = vsel %vm138_vm9, %v139_v30, %v180_v29 }
  0xd2   :  { %v137_v8 = vsel %vm135_vm10, %v178_v28, %v136_v31 }
  0xd3   :  { %v141_v33 = vsel %vm134_vm11, %v137_v8, %v140_v32 }
  0xd4   :  { %v142_v34 = vsel %vm131_vm12, nan, %v141_v33 }
  0xd5   :  { %143 = vst [vmem:[#allocation2] sm:$0xff] %v142_v34 }
  0xd6   :  { %192 = shalt.err (!%p189_p4)
}
  0xd7   :  { %s193_s20 = scalar_lea.hbm %s278_s3, 128 }
  0xd8   :  { %p194_p5 = scmp.ne.s32.totalorder %s278_s3, %s193_s20  ;;  %p197_p6 = scmp.lt.u32.totalorder %s193_s20, %s278_s3 }
  0xda   :  { %p199_p7 = pnand %p197_p6, %p194_p5 }
  0xdc   :  { %202 = shalt.err (!%p199_p7)
}
  0xdd   :  { %153 = dma.vmem_to_hbm [thread:$0]  %s151_s1, 128, %s278_s3, [#allocation3]  }
  0xde   :  { %203 = dma.done.wait [#allocation3], 128  }
  0xdf   :  { %204 = vsyncadd [#allocation3], 4294967168 }
  0xe0   :  { %157 = vsyncpa [#allocation3], 1 }

</bundles_post_ra>
